<compile_context>
chip_gen: v7x
topology: tpu7x:2x2x1
jax: 0.10.0
libtpu: 0.0.40
codegen_flags: <defaults>
</compile_context>

<pallas_src>
import jax
import jax.numpy as jnp
from jax.experimental import pallas as pl
from jax.experimental.pallas import tpu as pltpu


def _round_up(x, m):
    return ((x + m - 1) // m) * m


def _ce_kernel(logits_ref, labels_ref, wy_ref, out_ref, num_ref, den_ref):
    i = pl.program_id(0)

    @pl.when(i == 0)
    def _():
        num_ref[...] = jnp.zeros_like(num_ref)
        den_ref[...] = jnp.zeros_like(den_ref)

    x = logits_ref[...].astype(jnp.float32)            # (TN, C)
    y = labels_ref[...]                                # (TN, 1) int32
    wy = wy_ref[...]                                   # (TN, 1) f32  (weight[y], 0 for padding)

    # numerically-stable log-softmax pieces
    m = jnp.max(x, axis=-1, keepdims=True)             # (TN, 1)
    z = x - m                                          # (TN, C)
    lse = jnp.log(jnp.sum(jnp.exp(z), axis=-1, keepdims=True))  # (TN, 1)

    # gather target logit via select-then-reduce (no f32 one-hot materialized)
    cls = jax.lax.broadcasted_iota(jnp.int32, z.shape, 1)        # (TN, C)
    picked = jnp.sum(jnp.where(cls == y, z, 0.0), axis=-1, keepdims=True)  # (TN, 1)

    loss_i = lse - picked                              # (TN, 1) per-sample NLL

    # Row-resident accumulation: pure VPU adds in the steady state; the cross-sublane
    # reduction is deferred to the final grid step.
    num_ref[...] += wy * loss_i                        # (TN, 1)
    den_ref[...] += wy                                 # (TN, 1)

    @pl.when(i == pl.num_programs(0) - 1)
    def _():
        num_tot = jnp.sum(num_ref[...], keepdims=True)             # (1, 1)
        den_tot = jnp.sum(den_ref[...], keepdims=True)             # (1, 1)
        out_ref[...] = num_tot / den_tot


def ce_loss(predicted, labels, weight_ce):
    """CrossEntropyLoss(weight=weight_ce)(predicted, labels), reduction='mean'."""
    N, C = predicted.shape
    labels = labels.astype(jnp.int32)

    # Precompute per-sample class weight outside the kernel (removes an (N, C) pass).
    wy = weight_ce.astype(jnp.float32)[labels]                    # (N,)

    # ---- tile sizing: biggest batch tile whose double-buffered logits stream fits budget ----
    itemsize = jnp.dtype(predicted.dtype).itemsize
    budget_bytes = 8 * 1024 * 1024                                # per-input double-buffer budget
    max_tn = max(8, (budget_bytes // (2 * C * itemsize)) // 8 * 8)
    tn = int(min(512, max_tn, _round_up(N, 8)))
    n_pad = _round_up(N, tn)
    grid = (n_pad // tn,)
    # TODO(synk): for vocab-scale C that doesn't fit a (tn, C) VMEM tile, add a second
    # ("arbitrary") grid axis over C with online max/LSE accumulation in scratch.

    pad = n_pad - N
    if pad:
        predicted_p = jnp.pad(predicted, ((0, pad), (0, 0)))
        labels_p = jnp.pad(labels, ((0, pad),))
        wy_p = jnp.pad(wy, ((0, pad),))
    else:
        predicted_p, labels_p, wy_p = predicted, labels, wy

    labels2d = labels_p.reshape(n_pad, 1)
    wy2d = wy_p.reshape(n_pad, 1)

    out = pl.pallas_call(
        _ce_kernel,
        out_shape=jax.ShapeDtypeStruct((1, 1), jnp.float32),
        grid_spec=pltpu.PrefetchScalarGridSpec(
            num_scalar_prefetch=0,
            grid=grid,
            in_specs=[
                pl.BlockSpec((tn, C), lambda i: (i, 0)),   # logits tile (source dtype)
                pl.BlockSpec((tn, 1), lambda i: (i, 0)),   # labels tile
                pl.BlockSpec((tn, 1), lambda i: (i, 0)),   # weight[y] tile
            ],
            out_specs=pl.BlockSpec((1, 1), lambda i: (0, 0)),
            scratch_shapes=[
                pltpu.VMEM((tn, 1), jnp.float32),          # per-row numerator accumulator
                pltpu.VMEM((tn, 1), jnp.float32),          # per-row denominator accumulator
            ],
        ),
        compiler_params=pltpu.CompilerParams(
            dimension_semantics=("arbitrary",),            # cross-step accumulator -> reduction axis
            vmem_limit_bytes=32 * 1024 * 1024,
        ),
        cost_estimate=pl.CostEstimate(
            flops=5 * n_pad * C,
            transcendentals=n_pad * C,
            bytes_accessed=n_pad * C * itemsize + n_pad * 8 + 4,
        ),
    )(predicted_p, labels2d, wy2d)
    return out[0, 0]


def _ce_ref(predicted, labels, weight_ce):
    # pure-JAX reference matching torch.nn.CrossEntropyLoss(weight=...)
    x = predicted.astype(jnp.float32)
    logp = jax.nn.log_softmax(x, axis=-1)
    nll = -jnp.take_along_axis(logp, labels[:, None], axis=-1)[:, 0]
    wy = weight_ce[labels]
    return jnp.sum(wy * nll) / jnp.sum(wy)


if __name__ == "__main__":
    N, C = 8, 16  # batch=8 samples, 16 classes

    key = jax.random.PRNGKey(0)
    k_logits, k_labels = jax.random.split(key)
    predicted = jax.random.normal(k_logits, (N, C), dtype=jnp.float32)
    labels = jax.random.randint(k_labels, (N,), 0, C, dtype=jnp.int32)

    # deterministic class-weight init (shape (C,), as weight_CE in __init__)
    weight_ce = 0.5 + jnp.arange(C, dtype=jnp.float32) / C

    loss = ce_loss(predicted, labels, weight_ce)
    jax.block_until_ready(loss)

    ref = _ce_ref(predicted, labels, weight_ce)
    assert jnp.allclose(loss, ref, rtol=1e-5, atol=1e-5), (loss, ref)

    print("KERNEL_OK")
</pallas_src>

<mosaic_0001>
module attributes {stable_mosaic.version = 11 : i64} {
  func.func @_ce_kernel(%arg0: i32, %arg1: memref<8x16xf32, #tpu.memory_space<vmem>>, %arg2: memref<8x1xi32, #tpu.memory_space<vmem>>, %arg3: memref<8x1xf32, #tpu.memory_space<vmem>>, %arg4: memref<1x1xf32, #tpu.memory_space<vmem>>, %arg5: memref<8x1xf32, #tpu.memory_space<vmem>>, %arg6: memref<8x1xf32, #tpu.memory_space<vmem>>) attributes {dimension_semantics = [#tpu.dimension_semantics<arbitrary>], iteration_bounds = array<i64: 1>, scalar_prefetch = 0 : i64, scratch_operands = 2 : i64, tpu.core_type = #tpu.core_type<tc>, window_params = [{transform_indices = @transform_0, window_bounds = array<i64: 8, 16>}, {transform_indices = @transform_1, window_bounds = array<i64: 8, 1>}, {transform_indices = @transform_2, window_bounds = array<i64: 8, 1>}, {pipeline_mode = #tpu.pipeline_mode<synchronous>, transform_indices = @transform_3, window_bounds = array<i64: 1, 1>}]} {
    %c0_i32 = arith.constant 0 : i32
    %0 = arith.cmpi eq, %arg0, %c0_i32 : i32
    %1 = arith.extui %0 : i1 to i32
    %c0_i32_0 = arith.constant 0 : i32
    %2 = arith.cmpi ne, %1, %c0_i32_0 : i32
    scf.if %2 {
      %cst_19 = arith.constant 0.000000e+00 : f32
      %32 = vector.broadcast %cst_19 : f32 to vector<8x1xf32>
      %c0_20 = arith.constant 0 : index
      %c0_21 = arith.constant 0 : index
      %33 = vector.load %arg5[%c0_20, %c0_21] : memref<8x1xf32, #tpu.memory_space<vmem>>, vector<8x1xf32>
      tpu.vector_store %arg5[%c0_20, %c0_21], %32 {strides = array<i32>} : memref<8x1xf32, #tpu.memory_space<vmem>>, vector<8x1xf32>,
      %cst_22 = arith.constant 0.000000e+00 : f32
      %34 = vector.broadcast %cst_22 : f32 to vector<8x1xf32>
      %c0_23 = arith.constant 0 : index
      %c0_24 = arith.constant 0 : index
      %35 = vector.load %arg6[%c0_23, %c0_24] : memref<8x1xf32, #tpu.memory_space<vmem>>, vector<8x1xf32>
      tpu.vector_store %arg6[%c0_23, %c0_24], %34 {strides = array<i32>} : memref<8x1xf32, #tpu.memory_space<vmem>>, vector<8x1xf32>,
    } else {
    }
    %c0 = arith.constant 0 : index
    %c0_1 = arith.constant 0 : index
    %3 = vector.load %arg1[%c0, %c0_1] : memref<8x16xf32, #tpu.memory_space<vmem>>, vector<8x16xf32>
    %c0_2 = arith.constant 0 : index
    %c0_3 = arith.constant 0 : index
    %4 = vector.load %arg2[%c0_2, %c0_3] : memref<8x1xi32, #tpu.memory_space<vmem>>, vector<8x1xi32>
    %c0_4 = arith.constant 0 : index
    %c0_5 = arith.constant 0 : index
    %5 = vector.load %arg3[%c0_4, %c0_5] : memref<8x1xf32, #tpu.memory_space<vmem>>, vector<8x1xf32>
    %cst = arith.constant dense<0xFF800000> : vector<8xf32>
    %6 = vector.multi_reduction <maximumf>, %3, %cst [1] : vector<8x16xf32> to vector<8xf32>
    %7 = vector.shape_cast %6 : vector<8xf32> to vector<8x1xf32>
    %8 = vector.broadcast %7 : vector<8x1xf32> to vector<8x16xf32>
    %9 = arith.subf %3, %8 : vector<8x16xf32>
    %10 = math.exp %9 : vector<8x16xf32>
    %cst_6 = arith.constant dense<0.000000e+00> : vector<8xf32>
    %11 = vector.multi_reduction <add>, %10, %cst_6 [1] : vector<8x16xf32> to vector<8xf32>
    %12 = vector.shape_cast %11 : vector<8xf32> to vector<8x1xf32>
    %13 = math.log %12 : vector<8x1xf32>
    %14 = tpu.iota {dimensions = array<i32: 1>} : vector<8x16xi32>
    %15 = vector.broadcast %4 : vector<8x1xi32> to vector<8x16xi32>
    %16 = arith.cmpi eq, %14, %15 : vector<8x16xi32>
    %cst_7 = arith.constant 0.000000e+00 : f32
    %17 = vector.broadcast %cst_7 : f32 to vector<8x16xf32>
    %18 = arith.select %16, %9, %17 : vector<8x16xi1>, vector<8x16xf32>
    %cst_8 = arith.constant dense<0.000000e+00> : vector<8xf32>
    %19 = vector.multi_reduction <add>, %18, %cst_8 [1] : vector<8x16xf32> to vector<8xf32>
    %20 = vector.shape_cast %19 : vector<8xf32> to vector<8x1xf32>
    %21 = arith.subf %13, %20 : vector<8x1xf32>
    %c0_9 = arith.constant 0 : index
    %c0_10 = arith.constant 0 : index
    %22 = vector.load %arg5[%c0_9, %c0_10] : memref<8x1xf32, #tpu.memory_space<vmem>>, vector<8x1xf32>
    %23 = arith.mulf %5, %21 : vector<8x1xf32>
    %24 = arith.addf %22, %23 : vector<8x1xf32>
    %c0_11 = arith.constant 0 : index
    %c0_12 = arith.constant 0 : index
    %25 = vector.load %arg5[%c0_11, %c0_12] : memref<8x1xf32, #tpu.memory_space<vmem>>, vector<8x1xf32>
    tpu.vector_store %arg5[%c0_11, %c0_12], %24 {strides = array<i32>} : memref<8x1xf32, #tpu.memory_space<vmem>>, vector<8x1xf32>,
    %c0_13 = arith.constant 0 : index
    %c0_14 = arith.constant 0 : index
    %26 = vector.load %arg6[%c0_13, %c0_14] : memref<8x1xf32, #tpu.memory_space<vmem>>, vector<8x1xf32>
    %27 = arith.addf %26, %5 : vector<8x1xf32>
    %c0_15 = arith.constant 0 : index
    %c0_16 = arith.constant 0 : index
    %28 = vector.load %arg6[%c0_15, %c0_16] : memref<8x1xf32, #tpu.memory_space<vmem>>, vector<8x1xf32>
    tpu.vector_store %arg6[%c0_15, %c0_16], %27 {strides = array<i32>} : memref<8x1xf32, #tpu.memory_space<vmem>>, vector<8x1xf32>,
    %c0_i32_17 = arith.constant 0 : i32
    %29 = arith.cmpi eq, %arg0, %c0_i32_17 : i32
    %30 = arith.extui %29 : i1 to i32
    %c0_i32_18 = arith.constant 0 : i32
    %31 = arith.cmpi ne, %30, %c0_i32_18 : i32
    scf.if %31 {
      %c0_19 = arith.constant 0 : index
      %c0_20 = arith.constant 0 : index
      %32 = vector.load %arg5[%c0_19, %c0_20] : memref<8x1xf32, #tpu.memory_space<vmem>>, vector<8x1xf32>
      %33 = vector.shape_cast %32 : vector<8x1xf32> to vector<1x8x1xf32>
      %cst_21 = arith.constant dense<0.000000e+00> : vector<1xf32>
      %34 = vector.multi_reduction <add>, %33, %cst_21 [1, 2] : vector<1x8x1xf32> to vector<1xf32>
      %35 = vector.shape_cast %34 : vector<1xf32> to vector<1x1x1xf32>
      %36 = vector.extract %35[0, 0, 0] : f32 from vector<1x1x1xf32>
      %37 = vector.broadcast %36 : f32 to vector<1x1xf32>
      %c0_22 = arith.constant 0 : index
      %c0_23 = arith.constant 0 : index
      %38 = vector.load %arg6[%c0_22, %c0_23] : memref<8x1xf32, #tpu.memory_space<vmem>>, vector<8x1xf32>
      %39 = vector.shape_cast %38 : vector<8x1xf32> to vector<1x8x1xf32>
      %cst_24 = arith.constant dense<0.000000e+00> : vector<1xf32>
      %40 = vector.multi_reduction <add>, %39, %cst_24 [1, 2] : vector<1x8x1xf32> to vector<1xf32>
      %41 = vector.shape_cast %40 : vector<1xf32> to vector<1x1x1xf32>
      %42 = vector.extract %41[0, 0, 0] : f32 from vector<1x1x1xf32>
      %43 = vector.broadcast %42 : f32 to vector<1x1xf32>
      %44 = arith.divf %37, %43 : vector<1x1xf32>
      %c0_25 = arith.constant 0 : index
      %c0_26 = arith.constant 0 : index
      %45 = vector.load %arg4[%c0_25, %c0_26] : memref<1x1xf32, #tpu.memory_space<vmem>>, vector<1x1xf32>
      tpu.vector_store %arg4[%c0_25, %c0_26], %44 {strides = array<i32>} : memref<1x1xf32, #tpu.memory_space<vmem>>, vector<1x1xf32>,
    } else {
    }
    return
  }
  func.func @transform_0(%arg0: i32) -> (i32, i32) {
    %c0_i32 = arith.constant 0 : i32
    %c0_i32_0 = arith.constant 0 : i32
    return %arg0, %c0_i32 : i32, i32
  }
  func.func @transform_1(%arg0: i32) -> (i32, i32) {
    %c0_i32 = arith.constant 0 : i32
    %c0_i32_0 = arith.constant 0 : i32
    return %arg0, %c0_i32 : i32, i32
  }
  func.func @transform_2(%arg0: i32) -> (i32, i32) {
    %c0_i32 = arith.constant 0 : i32
    %c0_i32_0 = arith.constant 0 : i32
    return %arg0, %c0_i32 : i32, i32
  }
  func.func @transform_3(%arg0: i32) -> (i32, i32) {
    %c0_i32 = arith.constant 0 : i32
    %c0_i32_0 = arith.constant 0 : i32
    %c0_i32_1 = arith.constant 0 : i32
    return %c0_i32, %c0_i32_0 : i32, i32
  }
}

</mosaic_0001>

<bundles_post_ra>
// kernel: tpu_custom_call.1
= control target key start
LH: loop header
LB: loop body
LE: loop exit
PB: predicated region body
PF: predicated region fallthrough
CT: control target
= control target key end

     0   :  { %vm25_vm0 = vcmask 130048   ;;  %s192_s0 = inlined_call_operand.vmem [shape: f32[8,16], index: 0, kind: input, shape index: {}]   ;;  %s193_s1 = inlined_call_operand.vmem [shape: s32[8,1], index: 1, kind: input, shape index: {}]   ;;  %s194_s2 = inlined_call_operand.vmem [shape: f32[8,1], index: 2, kind: input, shape index: {}]   ;;  %s195_s3 = inlined_call_operand.hbm [shape: f32[1,1], index: 3, kind: output, shape index: {}]  }
   0x1   :  { %v22_v0 = vld [vmem:[%s192_s0] sm:$0xff] }
   0x2   :  { %8 = vsyncpa [#allocation5], 0  ;;  %v26_v1 = vsel %vm25_vm0, %v22_v0, -inf  ;;  %v139_v2 = vmov 0   ;;  %v23_v3 = vld [vmem:[%s193_s1] sm:$0xff]  ;;  %v37_v7 = vlaneseq  ;;  %vm19_vm2 = vcmask 7168  }
   0x3   :  { %108 = vset.pattern.permute.xlu0 %v139_v2  ;;  %v140_v14 = vmov 0.0   ;;  %v24_v15 = vld [vmem:[%s194_s2] sm:$0xff]  ;;  %s141_s17 = smov [#allocation4]   ;;  %vm85_vm3 = vcmask 0  }
   0x4   :  { %27 = vmax.xlane.f32.xlu0 %v26_v1  ;;  %v38_v8 = vand.u32 127, %v37_v7  ;;  %20 = vst.msk [vmem:[#allocation2] sm:$0xff] %vm19_vm2, %v140_v14  ;;  %21 = vst.msk [vmem:[#allocation3] sm:$0xff] %vm19_vm2, %v140_v14  ;;  %s93_s18 = sshll.u32 %s141_s17, 4  ;;  %s94_s18 = int_to_ptr.vmem [resolvable:$true] %s93_s18 }
   0x5   :  { %s115_s19 = scalar_lea.vmem %s94_s18, 16  ;;  %s119_s20 = scalar_lea.vmem %s94_s18, 32 }
   0x6   :  { %p116_p0 = scmp.ne.s32.totalorder %s94_s18, %s115_s19  ;;  %p120_p1 = scmp.lt.s32.totalorder %s94_s18, %s94_s18 }
   0x7   :  { %p121_p2 = scmp.lt.s32.totalorder %s119_s20, %s115_s19 }
   0x9   :  { %p122_p3 = por %p121_p2, %p120_p1 }
   0xb   :  { %v53_v16 = vld [vmem:[#allocation3] sm:$0xff]  ;;  %v48_v23 = vld [vmem:[#allocation2] sm:$0xff]  ;;  %p123_p4 = pnand %p122_p3, %p116_p0 }
   0xc   :  { %v54_v17 = vadd.f32 %v53_v16, %v24_v15 }
   0xe   :  { %55 = vst.msk [vmem:[#allocation3] sm:$0xff] %vm19_vm2, %v54_v17 }
  0x15   :  { %v71_v27 = vld [vmem:[#allocation3] sm:$0xff] }
  0x16   :  { %v72_v29 = vsel %vm19_vm2, %v71_v27, 0.0 }
  0x1a   :  { %40 = vperm.xlu0 %108, %v23_v3  }
  0x91   :  { %v28_v4 = vpop.xlane.xlu0 %27 }
  0x92   :  { %v29_v5 = vsub.f32 %v22_v0, %v28_v4 }
  0x94   :  { %v30_v6 = vmul.f32 1.442695, %v29_v5 }
  0x96   :  { %109 = vpow2.f32 %v30_v6 }
  0x99   :  { %v41_v9 = vpop.permute.xlu0 %40 }
  0x9a   :  { %vm42_vm1 = vcmp.eq.s32.totalorder %v38_v8, %v41_v9 }
  0x9b   :  { %v43_v12 = vsel %vm42_vm1, %v29_v5, 0.0 }
  0x9c   :  { %v44_v13 = vsel %vm25_vm0, %v43_v12, 0.0 }
  0xa0   :  { %v110_v10 = vpop.eup %109 }
  0xa1   :  { %v32_v11 = vsel %vm25_vm0, %v110_v10, 0.0 }
  0xa2   :  { %33 = vadd.xlane.f32.xlu1 %v32_v11 }
  0xa6   :  { %45 = vadd.xlane.f32.xlu1 %v44_v13 }
 0x12f   :  { %v34_v18 = vpop.xlane.xlu1 %33 }
 0x130   :  { %111 = vlog2.f32 %v34_v18 }
 0x133   :  { %v46_v21 = vpop.xlane.xlu1 %45 }
 0x13a   :  { %v112_v19 = vpop.eup %111 }
 0x13b   :  { %v36_v20 = vmul.f32 0.6931472, %v112_v19 }
 0x13d   :  { %v47_v22 = vsub.f32 %v36_v20, %v46_v21 }
 0x13f   :  { %v49_v24 = vmul.f32 %v47_v22, %v24_v15 }
 0x141   :  { %v50_v25 = vadd.f32 %v49_v24, %v48_v23 }
 0x143   :  { %52 = vst.msk [vmem:[#allocation2] sm:$0xff] %vm19_vm2, %v50_v25 }
 0x14a   :  { %v59_v26 = vld [vmem:[#allocation2] sm:$0xff] }
 0x14b   :  { %v60_v28 = vsel %vm19_vm2, %v59_v26, 0.0 }
 0x14c   :  { %61 = vadd.xlane.f32.xlu1 %v60_v28 }
 0x150   :  { %73 = vadd.xlane.f32.xlu1 %v72_v29 }
 0x1d9   :  { %v62_v30 = vpop.xlane.xlu1 %61 }
 0x1da   :  { %v63_v31 = vrot.slane %v62_v30, 4 }
 0x1dc   :  { %v64_v32 = vadd.f32 %v63_v31, %v62_v30 }
 0x1dd   :  { %v74_v33 = vpop.xlane.xlu1 %73 }
 0x1de   :  { %v65_v34 = vrot.slane %v64_v32, 2  ;;  %v75_v35 = vrot.slane %v74_v33, 4 }
 0x1e0   :  { %v76_v36 = vadd.f32 %v75_v35, %v74_v33  ;;  %v66_v37 = vadd.f32 %v65_v34, %v64_v32 }
 0x1e2   :  { %v77_v38 = vrot.slane %v76_v36, 2  ;;  %v67_v39 = vrot.slane %v66_v37, 1 }
 0x1e4   :  { %v78_v40 = vadd.f32 %v77_v38, %v76_v36  ;;  %v68_v41 = vadd.f32 %v67_v39, %v66_v37 }
 0x1e6   :  { %101 = vpush %v68_v41  ;;  %v79_v42 = vrot.slane %v78_v40, 1 }
 0x1e8   :  { %v80_v43 = vadd.f32 %v79_v42, %v78_v40 }
 0x1ea   :  { %103 = vpush %v80_v43 }
 0x217   :  { %s102_s2 = spop %101 }
 0x218   :  { %v70_v46 = vstv %s102_s2 }
 0x21b   :  { %s104_s16 = spop %103 }
 0x21c   :  { %v82_v44 = vstv %s104_s16 }
 0x21d   :  { %113 = vrcp.f32 %v82_v44 }
 0x227   :  { %v114_v45 = vpop.eup %113 }
 0x228   :  { %v84_v47 = vmul.f32 %v114_v45, %v70_v46 }
 0x22a   :  { %86 = vst.msk [vmem:[#allocation4] sm:$0x1] %vm85_vm3, %v84_v47 }
 0x22b   :  { %126 = shalt.err (!%p123_p4)
}
 0x22c   :  { %s127_s23 = scalar_lea.hbm %s195_s3, 16 }
 0x22d   :  { %p128_p5 = scmp.ne.s32.totalorder %s195_s3, %s127_s23  ;;  %p131_p6 = scmp.lt.u32.totalorder %s127_s23, %s195_s3 }
 0x22f   :  { %p133_p7 = pnand %p131_p6, %p128_p5 }
 0x231   :  { %136 = shalt.err (!%p133_p7)
}
 0x232   :  { %96 = dma.vmem_to_hbm [thread:$0]  %s94_s18, 16, %s195_s3, [#allocation5]  }
 0x233   :  { %137 = dma.done.wait [#allocation5], 16  }
 0x234   :  { %138 = vsyncadd [#allocation5], 4294967280 }
 0x235   :  { %100 = vsyncpa [#allocation5], 1 }

</bundles_post_ra>
